<compile_context>
chip_gen: v6e
topology: v6e:2x2x1
jax: 0.10.0
libtpu: 0.0.40
codegen_flags: <defaults>
</compile_context>

<pallas_src>
import functools

import jax
import jax.numpy as jnp
from jax.experimental import pallas as pl
from jax.experimental.pallas import tpu as pltpu


def _round_up(x, m):
    return (x + m - 1) // m * m


def _qnet_kernel(dueling, action_size, r1, r2, r3, state_ref, p_ref, q_ref):
    """state_ref: (B, r1); p_ref: (r1+r2+r3+8, L); q_ref: (B, L).

    Packed param layout (all bands zero-padded, 8-row aligned, L lanes wide):
      rows [0, r1)            : w1   (state_size, fc1)
      rows [r1, r1+r2)        : w2   (fc1, fc2)
      rows [r1+r2, r1+r2+r3)  : w3|w3_2 fused heads (fc2, action_size+1)
      rows [ob, ob+8)         : bias band; row 0=b1, row 1=b2, row 2=b_heads
    """
    o2 = r1
    o3 = r1 + r2
    ob = r1 + r2 + r3

    x = state_ref[...]                       # (B, r1)
    w1 = p_ref[0:o2, :]                      # (r1, L)
    w2 = p_ref[o2:o3, :]                     # (r2, L)
    wh = p_ref[o3:ob, :]                     # (r3, L)
    bb = p_ref[ob:ob + 8, :]                 # (8, L)

    # fc1 + relu  (zero-padded lanes stay exactly zero through the relu)
    h1 = jnp.maximum(
        jnp.dot(x, w1, preferred_element_type=jnp.float32) + bb[0:1, :], 0.0)
    # fc2 + relu
    h2 = jnp.maximum(
        jnp.dot(h1[:, :r2], w2, preferred_element_type=jnp.float32) + bb[1:2, :],
        0.0)
    # fused heads: cols [0, A) = advantage (fc3), col A = value (fc3_2)
    yc = jnp.dot(h2[:, :r3], wh, preferred_element_type=jnp.float32) + bb[2:3, :]

    if dueling:
        adv = yc[:, :action_size]
        value = yc[:, action_size:action_size + 1]
        # Fold the global scalar mean into the (B,1) value column, then do a
        # single broadcast add over the lane-dense slab.  Columns >= A hold
        # don't-care values and are sliced off by the wrapper.
        q = yc + (value - jnp.mean(adv))
    else:
        q = yc

    q_ref[...] = q.astype(q_ref.dtype)


def pack_qnet_params(params, state_size, action_size, fc1_units=64, fc2_units=32):
    """Packs (w1,b1,w2,b2,w3,b3,w32,b32) into one zero-padded (rows, L) buffer.

    Weights are (in, out); biases are (1, out).  The two output heads are
    fused column-wise: cols [0, A) = fc3, col A = fc3_2.
    """
    w1, b1, w2, b2, w3, b3, w32, b32 = params
    a1 = action_size + 1
    L = _round_up(max(fc1_units, fc2_units, a1), 128)
    r1 = _round_up(state_size, 8)
    r2 = _round_up(fc1_units, 8)
    r3 = _round_up(fc2_units, 8)
    ob = r1 + r2 + r3

    wh = jnp.concatenate([w3, w32], axis=1)      # (fc2, A+1)
    bh = jnp.concatenate([b3, b32], axis=1)      # (1, A+1)

    buf = jnp.zeros((ob + 8, L), jnp.float32)
    buf = buf.at[0:state_size, 0:fc1_units].set(w1)
    buf = buf.at[r1:r1 + fc1_units, 0:fc2_units].set(w2)
    buf = buf.at[r1 + r2:r1 + r2 + fc2_units, 0:a1].set(wh)
    buf = buf.at[ob, 0:fc1_units].set(b1[0])
    buf = buf.at[ob + 1, 0:fc2_units].set(b2[0])
    buf = buf.at[ob + 2, 0:a1].set(bh[0])
    return buf


def qnetwork_forward(state, packed_params, mode, *, state_size, action_size,
                     fc1_units=64, fc2_units=32):
    """Runs the QNetwork forward pass with a single Pallas kernel call."""
    batch = state.shape[0]
    dueling = mode in ("Dueling", "Double Dueling")
    a1 = action_size + 1
    L = _round_up(max(fc1_units, fc2_units, a1), 128)
    r1 = _round_up(state_size, 8)
    r2 = _round_up(fc1_units, 8)
    r3 = _round_up(fc2_units, 8)

    if state_size < r1:  # zero-pad state features to the w1 band height
        state = jnp.pad(state, ((0, 0), (0, r1 - state_size)))

    kernel = functools.partial(_qnet_kernel, dueling, action_size, r1, r2, r3)

    flops = 2 * batch * (state_size * fc1_units + fc1_units * fc2_units
                         + fc2_units * a1)
    bytes_accessed = 4 * (state.size + packed_params.size + batch * L)

    vmem = pl.BlockSpec(memory_space=pltpu.VMEM)
    q_pad = pl.pallas_call(
        kernel,
        out_shape=jax.ShapeDtypeStruct((batch, L), jnp.float32),
        in_specs=[vmem, vmem],
        out_specs=vmem,
        cost_estimate=pl.CostEstimate(flops=flops, transcendentals=0,
                                      bytes_accessed=bytes_accessed),
    )(state, packed_params)
    # Lane-padded slab -> real action columns.
    return q_pad[:, :action_size]


def init_params(key, state_size, action_size, fc1_units=64, fc2_units=32):
    """Deterministic init mimicking nn.Linear defaults (uniform +-1/sqrt(fan_in)).

    Weights are returned transposed to (in, out); biases as (1, out).
    """
    def linear(key, fan_in, fan_out):
        kw, kb = jax.random.split(key)
        bound = 1.0 / jnp.sqrt(fan_in)
        w = jax.random.uniform(kw, (fan_in, fan_out), jnp.float32, -bound, bound)
        b = jax.random.uniform(kb, (1, fan_out), jnp.float32, -bound, bound)
        return w, b

    k1, k2, k3, k4 = jax.random.split(key, 4)
    w1, b1 = linear(k1, state_size, fc1_units)
    w2, b2 = linear(k2, fc1_units, fc2_units)
    w3, b3 = linear(k3, fc2_units, action_size)
    w32, b32 = linear(k4, fc2_units, 1)
    return (w1, b1, w2, b2, w3, b3, w32, b32)


def _reference_forward(state, params, mode):
    """Pure-JAX reference for correctness checking."""
    w1, b1, w2, b2, w3, b3, w32, b32 = params
    x = jnp.maximum(state @ w1 + b1, 0.0)
    x = jnp.maximum(x @ w2 + b2, 0.0)
    y = x @ w3 + b3
    if mode in ("Dueling", "Double Dueling"):
        value = x @ w32 + b32
        return y + value - jnp.mean(y)
    return y


if __name__ == "__main__":
    key = jax.random.PRNGKey(0)
    k_param, k_state = jax.random.split(key)

    batch = 8
    state_size = 8
    action_size = 4

    params = init_params(k_param, state_size, action_size)
    packed = pack_qnet_params(params, state_size, action_size)
    state = jax.random.normal(k_state, (batch, state_size), jnp.float32)

    for mode in ("Dueling", "Double Dueling", "DQN"):
        q = qnetwork_forward(state, packed, mode,
                             state_size=state_size, action_size=action_size)
        jax.block_until_ready(q)
        q_ref = _reference_forward(state, params, mode)
        assert q.shape == (batch, action_size)
        assert jnp.allclose(q, q_ref, atol=1e-5, rtol=1e-5), f"mismatch in mode {mode}"

    print("KERNEL_OK")
</pallas_src>

<mosaic_0001>
module attributes {stable_mosaic.version = 11 : i64} {
  func.func @_qnet_kernel(%arg0: memref<8x8xf32, #tpu.memory_space<vmem>>, %arg1: memref<112x128xf32, #tpu.memory_space<vmem>>, %arg2: memref<8x128xf32, #tpu.memory_space<vmem>>) attributes {dimension_semantics = [], scalar_prefetch = 0 : i64, scratch_operands = 0 : i64, tpu.core_type = #tpu.core_type<tc>} {
    %c0 = arith.constant 0 : index
    %c0_0 = arith.constant 0 : index
    %0 = vector.load %arg0[%c0, %c0_0] : memref<8x8xf32, #tpu.memory_space<vmem>>, vector<8x8xf32>
    %c0_1 = arith.constant 0 : index
    %c0_2 = arith.constant 0 : index
    %1 = vector.load %arg1[%c0_1, %c0_2] : memref<112x128xf32, #tpu.memory_space<vmem>>, vector<8x128xf32>
    %c8 = arith.constant 8 : index
    %c0_3 = arith.constant 0 : index
    %2 = vector.load %arg1[%c8, %c0_3] : memref<112x128xf32, #tpu.memory_space<vmem>>, vector<64x128xf32>
    %c72 = arith.constant 72 : index
    %c0_4 = arith.constant 0 : index
    %3 = vector.load %arg1[%c72, %c0_4] : memref<112x128xf32, #tpu.memory_space<vmem>>, vector<32x128xf32>
    %c104 = arith.constant 104 : index
    %c0_5 = arith.constant 0 : index
    %4 = vector.load %arg1[%c104, %c0_5] : memref<112x128xf32, #tpu.memory_space<vmem>>, vector<8x128xf32>
    %cst = arith.constant dense<0.000000e+00> : vector<8x128xf32>
    %5 = tpu.matmul %0, %1, %cst {dimension_numbers = #tpu.dot_dimension_numbers<[1], [0], [0], [1], [0, 0, 1, 1], [], []>} : vector<8x8xf32>, vector<8x128xf32>, vector<8x128xf32> -> vector<8x128xf32>
    %6 = vector.extract_strided_slice %4 {offsets = [0, 0], sizes = [1, 128], strides = [1, 1]} : vector<8x128xf32> to vector<1x128xf32>
    %7 = vector.broadcast %6 : vector<1x128xf32> to vector<8x128xf32>
    %8 = arith.addf %5, %7 : vector<8x128xf32>
    %cst_6 = arith.constant 0.000000e+00 : f32
    %9 = vector.broadcast %cst_6 : f32 to vector<8x128xf32>
    %10 = arith.maximumf %8, %9 : vector<8x128xf32>
    %11 = vector.extract_strided_slice %10 {offsets = [0, 0], sizes = [8, 64], strides = [1, 1]} : vector<8x128xf32> to vector<8x64xf32>
    %cst_7 = arith.constant dense<0.000000e+00> : vector<8x128xf32>
    %12 = tpu.matmul %11, %2, %cst_7 {dimension_numbers = #tpu.dot_dimension_numbers<[1], [0], [0], [1], [0, 0, 1, 1], [], []>} : vector<8x64xf32>, vector<64x128xf32>, vector<8x128xf32> -> vector<8x128xf32>
    %13 = vector.extract_strided_slice %4 {offsets = [1, 0], sizes = [1, 128], strides = [1, 1]} : vector<8x128xf32> to vector<1x128xf32>
    %14 = vector.broadcast %13 : vector<1x128xf32> to vector<8x128xf32>
    %15 = arith.addf %12, %14 : vector<8x128xf32>
    %cst_8 = arith.constant 0.000000e+00 : f32
    %16 = vector.broadcast %cst_8 : f32 to vector<8x128xf32>
    %17 = arith.maximumf %15, %16 : vector<8x128xf32>
    %18 = vector.extract_strided_slice %17 {offsets = [0, 0], sizes = [8, 32], strides = [1, 1]} : vector<8x128xf32> to vector<8x32xf32>
    %cst_9 = arith.constant dense<0.000000e+00> : vector<8x128xf32>
    %19 = tpu.matmul %18, %3, %cst_9 {dimension_numbers = #tpu.dot_dimension_numbers<[1], [0], [0], [1], [0, 0, 1, 1], [], []>} : vector<8x32xf32>, vector<32x128xf32>, vector<8x128xf32> -> vector<8x128xf32>
    %20 = vector.extract_strided_slice %4 {offsets = [2, 0], sizes = [1, 128], strides = [1, 1]} : vector<8x128xf32> to vector<1x128xf32>
    %21 = vector.broadcast %20 : vector<1x128xf32> to vector<8x128xf32>
    %22 = arith.addf %19, %21 : vector<8x128xf32>
    %23 = vector.extract_strided_slice %22 {offsets = [0, 0], sizes = [8, 4], strides = [1, 1]} : vector<8x128xf32> to vector<8x4xf32>
    %24 = vector.extract_strided_slice %22 {offsets = [0, 4], sizes = [8, 1], strides = [1, 1]} : vector<8x128xf32> to vector<8x1xf32>
    %25 = vector.shape_cast %23 : vector<8x4xf32> to vector<1x8x4xf32>
    %cst_10 = arith.constant dense<0.000000e+00> : vector<1xf32>
    %26 = vector.multi_reduction <add>, %25, %cst_10 [1, 2] : vector<1x8x4xf32> to vector<1xf32>
    %27 = vector.shape_cast %26 : vector<1xf32> to vector<1x1x1xf32>
    %28 = vector.extract %27[0, 0, 0] : f32 from vector<1x1x1xf32>
    %cst_11 = arith.constant 3.200000e+01 : f32
    %29 = arith.divf %28, %cst_11 : f32
    %30 = vector.broadcast %29 : f32 to vector<8x1xf32>
    %31 = arith.subf %24, %30 : vector<8x1xf32>
    %32 = vector.broadcast %31 : vector<8x1xf32> to vector<8x128xf32>
    %33 = arith.addf %22, %32 : vector<8x128xf32>
    %c0_12 = arith.constant 0 : index
    %c0_13 = arith.constant 0 : index
    %34 = vector.load %arg2[%c0_12, %c0_13] : memref<8x128xf32, #tpu.memory_space<vmem>>, vector<8x128xf32>
    tpu.vector_store %arg2[%c0_12, %c0_13], %33 {strides = array<i32>} : memref<8x128xf32, #tpu.memory_space<vmem>>, vector<8x128xf32>,
    return
  }
}

</mosaic_0001>

<bundles_post_ra>
// kernel: tpu_custom_call.1
= control target key start
LH: loop header
LB: loop body
LE: loop exit
PB: predicated region body
PF: predicated region fallthrough
CT: control target
= control target key end

     0   :  { %7 = vsyncpa [#allocation3], 0  ;;  %s494_s0 = inlined_call_operand.hbm [shape: f32[8,8], index: 0, kind: input, shape index: {}]   ;;  %s495_s1 = inlined_call_operand.hbm [shape: f32[112,128], index: 1, kind: input, shape index: {}]   ;;  %s496_s2 = inlined_call_operand.hbm [shape: f32[8,128], index: 2, kind: output, shape index: {}]  }
   0x1   :  { %8 = vsyncpa [#allocation6], 0 }
   0x2   :  { %9 = vsyncpa [#allocation4], 0  ;;  %s459_s9 = smov [#allocation2]   ;;  %s460_s11 = smov [#allocation5]  }
   0x3   :  { %s16_s10 = sshll.u32 %s459_s9, 4  ;;  %s25_s12 = sshll.u32 %s460_s11, 4  ;;  %s17_s10 = int_to_ptr.vmem [resolvable:$true] %s16_s10  ;;  %s26_s12 = int_to_ptr.vmem [resolvable:$true] %s25_s12 }
   0x4   :  { %s401_s13 = scalar_lea.vmem %s17_s10, 128  ;;  %p406_p1 = scmp.lt.s32.totalorder %s17_s10, %s17_s10 }
   0x5   :  { %p402_p0 = scmp.ne.s32.totalorder %s17_s10, %s401_s13  ;;  %p407_p2 = scmp.lt.s32.totalorder %s401_s13, %s401_s13 }
   0x7   :  { %p408_p3 = por %p407_p2, %p406_p1 }
   0x9   :  { %p409_p4 = pnand %p408_p3, %p402_p0 }
   0xb   :  { %412 = shalt.err (!%p409_p4)
}
   0xc   :  { %19 = dma.hbm_to_vmem [thread:$0]  %s494_s0, 128, %s17_s10, [#allocation3]  }
   0xd   :  { %s421_s16 = scalar_lea.vmem %s26_s12, 1792  ;;  %p426_p6 = scmp.lt.s32.totalorder %s26_s12, %s26_s12 }
   0xe   :  { %p422_p5 = scmp.ne.s32.totalorder %s26_s12, %s421_s16  ;;  %p427_p7 = scmp.lt.s32.totalorder %s421_s16, %s421_s16 }
  0x10   :  { %p428_p8 = por %p427_p7, %p426_p6 }
  0x12   :  { %p429_p9 = pnand %p428_p8, %p422_p5 }
  0x14   :  { %432 = shalt.err (!%p429_p9)
}
  0x15   :  { %s461_s17 = smov 128   ;;  %s462_s18 = smov 8  }
  0x16   :  { %31 = dma.hbm_to_vmem [thread:$0]  %s495_s1, 1792, %s26_s12, [#allocation6], %s461_s17, %s461_s17, %s462_s18  }
  0x17   :  { %453 = dma.done.wait [#allocation3], 128  }
  0x18   :  { %454 = vsyncadd [#allocation3], 4294967168 }
  0x19   :  { %455 = dma.done.wait [#allocation6], 1792  }
  0x1a   :  { %456 = vsyncadd [#allocation6], 4294965504  ;;  %v463_v0 = vmov 0.0   ;;  %vm464_vm0 = vmmov 0   ;;  %vm57_vm1 = vcmask 64512   ;;  %v39_v1 = vld [vmem:[#allocation5] sm:$0xff]  ;;  %v53_v12 = vlaneseq }
  0x1b   :  { %347 = vmatprep.subr.mxu0 %v463_v0  ;;  %349 = vmatprep.mubr.msk.f32.mxu0 %vm464_vm0, %v463_v0  ;;  %v38_v2 = vld [vmem:[#allocation2] sm:$0xff]  ;;  %v47_v3 = vld [vmem:[#allocation5 + $0x40] sm:$0xff]  ;;  %v45_v5 = vld [vmem:[#allocation5 + $0x30] sm:$0xff]  ;;  %vm136_vm2 = vcmask 523264   ;;  %vm215_vm3 = vcmask 261120   ;;  %vm289_vm4 = vcmask 31744  }
  0x1c   :  { %352 = vmatprep.subr.mxu1 %v463_v0  ;;  %368 = vmatprep.mubr.msk.f32.mxu1 %vm464_vm0, %v463_v0  ;;  %v46_v4 = vld [vmem:[#allocation5 + $0x38] sm:$0xff]  ;;  %v44_v6 = vld [vmem:[#allocation5 + $0x28] sm:$0xff]  ;;  %v43_v7 = vld [vmem:[#allocation5 + $0x20] sm:$0xff]  ;;  %v54_v13 = vshrl.u32 %v53_v12, 7  ;;  %v465_v36 = vmov 4   ;;  %s466_s21 = smov [#allocation7]  }
  0x1d   :  { %348 = vmatpush3.msra.mxu0 %v39_v1  ;;  %353 = vmatpush3.msra.mxu1 %v47_v3  ;;  %v42_v8 = vld [vmem:[#allocation5 + $0x18] sm:$0xff]  ;;  %v41_v9 = vld [vmem:[#allocation5 + $0x10] sm:$0xff]  ;;  %v40_v10 = vld [vmem:[#allocation5 + $0x8] sm:$0xff]  ;;  %s318_s22 = sshll.u32 %s466_s21, 4  ;;  %s319_s22 = int_to_ptr.vmem [resolvable:$true] %s318_s22 }
  0x1e   :  { %350 = vmatmul.mubr.msk.f32.vlgmr.msra.gmra.mxu0 %vm57_vm1, %v38_v2  ;;  %354 = vmatprep.subr.mxu1 %v463_v0  ;;  %v51_v11 = vld [vmem:[#allocation5 + $0x60] sm:$0xff]  ;;  %v55_v14 = vsub.s32 0, %v54_v13  ;;  %v52_v15 = vld [vmem:[#allocation5 + $0x68] sm:$0xff]  ;;  %v50_v21 = vld [vmem:[#allocation5 + $0x58] sm:$0xff]  ;;  %v134_v24 = vsub.s32 1, %v54_v13  ;;  %v213_v30 = vsub.s32 2, %v54_v13  ;;  %p438_p11 = scmp.lt.s32.totalorder %s319_s22, %s319_s22 }
  0x1f   :  { %355 = vmatpush3.msra.mxu1 %v46_v4  ;;  %371 = vmatprep.subr.mxu0 %v463_v0  ;;  %v49_v22 = vld [vmem:[#allocation5 + $0x50] sm:$0xff]  ;;  %v48_v23 = vld [vmem:[#allocation5 + $0x48] sm:$0xff]  ;;  %s433_s23 = scalar_lea.vmem %s319_s22, 128 }
  0x20   :  { %356 = vmatprep.subr.mxu1 %v463_v0  ;;  %379 = vmatprep.mubr.msk.f32.mxu0 %vm464_vm0, %v463_v0  ;;  %v56_v16 = vrot.slane %v52_v15, %v55_v14  ;;  %v135_v25 = vrot.slane %v52_v15, %v134_v24  ;;  %v214_v31 = vrot.slane %v52_v15, %v213_v30  ;;  %p434_p10 = scmp.ne.s32.totalorder %s319_s22, %s433_s23  ;;  %p439_p12 = scmp.lt.s32.totalorder %s433_s23, %s433_s23 }
  0x21   :  { %357 = vmatpush3.msra.mxu1 %v45_v5  ;;  %372 = vmatpush3.msra.mxu0 %v51_v11 }
  0x22   :  { %358 = vmatprep.subr.mxu1 %v463_v0  ;;  %373 = vmatprep.subr.mxu0 %v463_v0  ;;  %p440_p13 = por %p439_p12, %p438_p11 }
  0x23   :  { %359 = vmatpush3.msra.mxu1 %v44_v6  ;;  %374 = vmatpush3.msra.mxu0 %v50_v21 }
  0x24   :  { %360 = vmatprep.subr.mxu1 %v463_v0  ;;  %375 = vmatprep.subr.mxu0 %v463_v0  ;;  %p441_p0 = pnand %p440_p13, %p434_p10 }
  0x25   :  { %361 = vmatpush3.msra.mxu1 %v43_v7  ;;  %376 = vmatpush3.msra.mxu0 %v49_v22 }
  0x26   :  { %362 = vmatprep.subr.mxu1 %v463_v0  ;;  %377 = vmatprep.subr.mxu0 %v463_v0 }
  0x27   :  { %363 = vmatpush3.msra.mxu1 %v42_v8  ;;  %378 = vmatpush3.msra.mxu0 %v48_v23 }
  0x28   :  { %364 = vmatprep.subr.mxu1 %v463_v0  ;;  %392 = vset.pattern.permute.xlu0 %v465_v36 }
  0x29   :  { %365 = vmatpush3.msra.mxu1 %v41_v9 }
  0x2a   :  { %366 = vmatprep.subr.mxu1 %v463_v0 }
  0x2b   :  { %367 = vmatpush3.msra.mxu1 %v40_v10 }
  0xde   :  { %v127_v17 = vpop.f32.mrf.mxu0 }
  0xdf   :  { %v128_v18 = vadd.f32 %v127_v17, %v56_v16 }
  0xe0   :  { %v351_v19 = vpop.f32.mrf.mxu0 }
  0xe1   :  { %v131_v20 = vmax.f32 %v128_v18, 0.0 }
  0xe3   :  { %369 = vmatmul.mubr.msk.f32.vlgmr.msra.gmra.mxu1 %vm136_vm2, %v131_v20 }
 0x1a3   :  { %v206_v26 = vpop.f32.mrf.mxu1 }
 0x1a4   :  { %v207_v27 = vadd.f32 %v206_v26, %v135_v25 }
 0x1a5   :  { %v370_v28 = vpop.f32.mrf.mxu1 }
 0x1a6   :  { %v210_v29 = vmax.f32 %v207_v27, 0.0 }
 0x1a8   :  { %380 = vmatmul.mubr.msk.f32.vlgmr.msra.gmra.mxu0 %vm215_vm3, %v210_v29 }
 0x268   :  { %v285_v32 = vpop.f32.mrf.mxu0 }
 0x269   :  { %v286_v33 = vadd.f32 %v285_v32, %v214_v31 }
 0x26a   :  { %v381_v34 = vpop.f32.mrf.mxu0 }
 0x26b   :  { %v290_v35 = vsel %vm289_vm4, %v286_v33, 0.0 }
 0x26c   :  { %291 = vadd.xlane.f32.xlu0 %v290_v35 }
 0x2f5   :  { %v292_v37 = vpop.xlane.xlu0 %291 }
 0x2f6   :  { %v293_v38 = vrot.slane %v292_v37, 4 }
 0x2f8   :  { %v294_v39 = vadd.f32 %v293_v38, %v292_v37 }
 0x2fa   :  { %v295_v40 = vrot.slane %v294_v39, 2 }
 0x2fc   :  { %v296_v41 = vadd.f32 %v295_v40, %v294_v39 }
 0x2fe   :  { %v297_v42 = vrot.slane %v296_v41, 1 }
 0x300   :  { %v298_v43 = vadd.f32 %v297_v42, %v296_v41 }
 0x302   :  { %382 = vpush %v298_v43 }
 0x333   :  { %s383_s0 = spop %382 }
 0x334   :  { %s302_s1 = smul.f32 0.03125, %s383_s0 }
 0x336   :  { %v303_v44 = vstv %s302_s1 }
 0x337   :  { %v304_v45 = vsub.f32 %v286_v33, %v303_v44 }
 0x339   :  { %307 = vperm.xlu0 %392, %v304_v45  }
 0x3b4   :  { %v308_v46 = vpop.permute.xlu0 %307 }
 0x3b5   :  { %v310_v47 = vadd.f32 %v308_v46, %v286_v33 }
 0x3b7   :  { %311 = vst [vmem:[#allocation7] sm:$0xff] %v310_v47 }
 0x3b8   :  { %444 = shalt.err (!%p441_p0)
}
 0x3b9   :  { %321 = dma.vmem_to_hbm [thread:$0]  %s319_s22, 128, %s496_s2, [#allocation4]  }
 0x3ba   :  { %457 = dma.done.wait [#allocation4], 128  }
 0x3bb   :  { %458 = vsyncadd [#allocation4], 4294967168 }
 0x3bc   :  { %325 = vsyncpa [#allocation3], 1 }
 0x3bd   :  { %326 = vsyncpa [#allocation6], 1 }
 0x3be   :  { %327 = vsyncpa [#allocation4], 1 }

</bundles_post_ra>
